<compile_context>
chip_gen: v6e
topology: v6e:2x2x1
jax: 0.10.0
libtpu: 0.0.40
codegen_flags: <defaults>
</compile_context>

<pallas_src>
import jax
import jax.numpy as jnp
from jax.experimental import pallas as pl
from jax.experimental.pallas import tpu as pltpu

_LANE = 128


def _cdiv(a, b):
    return -(-a // b)


def _round_up(x, m):
    return ((x + m - 1) // m) * m


# ----------------------------------------------------------------------------
# Pallas kernel: one lane-tile of the transposed fused linear
#     o(N, TM) = W_T(N, K) @ x_T(K, TM) + b(N, 1)
# W_T and b are tiny and stay VMEM-resident across the whole grid; only the
# x_T / o lane tiles stream through the double-buffered pipeline.
# ----------------------------------------------------------------------------
def _linear_t_kernel(w_ref, x_ref, b_ref, o_ref):
    # In-kernel cast to the compute dtype (no wrapper-side pass over x).
    x = x_ref[...].astype(w_ref.dtype)
    acc = jnp.dot(w_ref[...], x, preferred_element_type=jnp.float32)
    o_ref[...] = (acc + b_ref[...]).astype(o_ref.dtype)


def _choose_lane_tile(m, *, max_tm=8192, min_steps=2):
    """Lane-axis tile (multiple of 128): big tiles, grid >= 2 when possible,
    even step count when > 2 (v7x two-TensorCore balance), padding <= 1 tile."""
    m_lane = _round_up(m, _LANE)
    n_steps = max(min_steps, _cdiv(m_lane, max_tm))
    if n_steps > 2 and n_steps % 2 == 1:
        n_steps += 1
    tm = _round_up(_cdiv(m_lane, n_steps), _LANE)
    grid = _cdiv(m_lane, tm)
    return tm, grid * tm, grid


def _pallas_linear_t(xT, wT, b_col, *, out_dtype=jnp.float32, max_lane_tile=8192):
    """xT: (K, M); wT: (N, K); b_col: (N, 1) f32 -> (N, m_pad) out_dtype.

    Returns the full padded buffer; the caller does one fused
    slice + reshape + transpose pass."""
    K, M = xT.shape
    N, Kw = wT.shape
    assert Kw == K
    assert M > 0, "B * node_num must be positive"

    tm, m_pad, grid_m = _choose_lane_tile(M, max_tm=max_lane_tile)
    if m_pad != M:
        xT = jnp.pad(xT, ((0, 0), (0, m_pad - M)))

    out_itemsize = jnp.dtype(out_dtype).itemsize
    cost = pl.CostEstimate(
        flops=2 * N * K * m_pad,
        transcendentals=0,
        bytes_accessed=(xT.size * xT.dtype.itemsize
                        + wT.size * wT.dtype.itemsize
                        + b_col.size * b_col.dtype.itemsize
                        + N * m_pad * out_itemsize),
    )

    # Double-buffered streamed tiles + resident W_T / b, with headroom,
    # always under the 32 MiB scoped default (v7x-safe).
    tile_bytes = (2 * (K * tm * xT.dtype.itemsize + N * tm * out_itemsize)
                  + K * N * wT.dtype.itemsize + N * 4)
    vmem_limit = int(min(32 * 1024 * 1024, max(8 * 1024 * 1024, 3 * tile_bytes)))

    out = pl.pallas_call(
        _linear_t_kernel,
        out_shape=jax.ShapeDtypeStruct((N, m_pad), out_dtype),
        grid_spec=pltpu.PrefetchScalarGridSpec(
            num_scalar_prefetch=0,
            grid=(grid_m,),
            in_specs=[
                pl.BlockSpec((N, K), lambda i: (0, 0)),    # resident W_T
                pl.BlockSpec((K, tm), lambda i: (0, i)),   # streamed input lanes
                pl.BlockSpec((N, 1), lambda i: (0, 0)),    # resident bias (f32)
            ],
            out_specs=pl.BlockSpec((N, tm), lambda i: (0, i)),
        ),
        compiler_params=pltpu.CompilerParams(
            dimension_semantics=("parallel",),   # megacore-shardable on v7x
            vmem_limit_bytes=vmem_limit,
        ),
        cost_estimate=cost,
    )(wT, xT, b_col)
    return out  # (N, m_pad)


# ----------------------------------------------------------------------------
# BaseModel in JAX
# ----------------------------------------------------------------------------
class BaseModelPallas:
    def __init__(self, node_num, input_dim, output_dim, seq_len=12, horizon=12,
                 compute_dtype=jnp.float32, max_lane_tile=8192):
        self.node_num = node_num
        self.input_dim = input_dim
        self.output_dim = output_dim
        self.seq_len = seq_len
        self.horizon = horizon
        self.compute_dtype = compute_dtype
        self.max_lane_tile = max_lane_tile

        K = seq_len * input_dim
        N = horizon * output_dim
        self.K, self.N = K, N

        # Deterministic synthetic parameters (no checkpoint loading).
        kw, kb = jax.random.split(jax.random.PRNGKey(42))
        self.W = (jax.random.normal(kw, (K, N), dtype=jnp.float32)
                  * (1.0 / jnp.sqrt(jnp.float32(K))))
        self.b = jax.random.normal(kb, (N,), dtype=jnp.float32) * 0.01

        # Kernel-side layouts: W_T (N, K) in compute dtype (tiny, one-time
        # host-side cast), bias as an (N, 1) f32 column added to the f32 acc.
        self.W_T = jnp.transpose(self.W).astype(compute_dtype)
        self.b_col = self.b.reshape(N, 1)
        # Output writeback dtype follows the compute dtype (bf16 halves it).
        self.out_dtype = compute_dtype

    def param_num(self):
        return self.W.size + self.b.size

    def __call__(self, x):
        # x: (B, seq_len, node_num, input_dim)
        B, T, Nn, C = x.shape
        assert T == self.seq_len and Nn == self.node_num and C == self.input_dim
        M = B * Nn
        assert M > 0

        # (B, T, Nn, C) -> (T*C, B*Nn): flattened window on sublanes, rows on lanes.
        xT = jnp.transpose(x, (1, 3, 0, 2)).reshape(self.K, M)

        yT = _pallas_linear_t(xT, self.W_T, self.b_col,
                              out_dtype=self.out_dtype,
                              max_lane_tile=self.max_lane_tile)   # (N, m_pad)

        # Single fused slice + reshape + transpose back to the canonical layout.
        y = yT[:, :M].reshape(self.horizon, self.output_dim, B, Nn)
        return jnp.transpose(y, (2, 0, 3, 1))   # (B, horizon, node_num, output_dim)


# ----------------------------------------------------------------------------
# Pure-JAX reference for a sanity check (unpadded parameters, row-major GEMM).
# ----------------------------------------------------------------------------
def _ref_forward(model, x):
    B, T, Nn, C = x.shape
    x2d = jnp.transpose(x, (0, 2, 1, 3)).reshape(B * Nn, T * C)
    y2d = x2d @ model.W + model.b
    y = y2d.reshape(B, Nn, model.horizon, model.output_dim)
    return jnp.transpose(y, (0, 2, 1, 3))


if __name__ == "__main__":
    # --- small demo consistent with the module's constructor signature ------
    B, node_num, input_dim, output_dim = 2, 8, 4, 2
    seq_len, horizon = 12, 12

    model = BaseModelPallas(node_num, input_dim, output_dim,
                            seq_len=seq_len, horizon=horizon)
    x = jax.random.normal(jax.random.PRNGKey(0),
                          (B, seq_len, node_num, input_dim), dtype=jnp.float32)

    out = jax.block_until_ready(model(x))
    ref = jax.block_until_ready(_ref_forward(model, x))
    assert out.shape == (B, horizon, node_num, output_dim)
    assert jnp.allclose(out, ref, atol=1e-4, rtol=1e-4)

    # --- second check: multi-step grid, lane padding, non-mult-of-8 N/K -----
    B2, node_num2, input_dim2, output_dim2 = 3, 200, 3, 1
    model2 = BaseModelPallas(node_num2, input_dim2, output_dim2,
                             seq_len=seq_len, horizon=horizon, max_lane_tile=256)
    x2 = jax.random.normal(jax.random.PRNGKey(1),
                           (B2, seq_len, node_num2, input_dim2), dtype=jnp.float32)
    out2 = jax.block_until_ready(model2(x2))
    ref2 = jax.block_until_ready(_ref_forward(model2, x2))
    assert out2.shape == (B2, horizon, node_num2, output_dim2)
    assert jnp.allclose(out2, ref2, atol=1e-4, rtol=1e-4)

    print("KERNEL_OK")
</pallas_src>

<mosaic_0001>
module attributes {stable_mosaic.version = 11 : i64} {
  func.func @_linear_t_kernel(%arg0: i32, %arg1: memref<24x48xf32, #tpu.memory_space<vmem>>, %arg2: memref<48x128xf32, #tpu.memory_space<vmem>>, %arg3: memref<24x1xf32, #tpu.memory_space<vmem>>, %arg4: memref<24x128xf32, #tpu.memory_space<vmem>>) attributes {dimension_semantics = [#tpu.dimension_semantics<parallel>], iteration_bounds = array<i64: 1>, scalar_prefetch = 0 : i64, scratch_operands = 0 : i64, tpu.core_type = #tpu.core_type<tc>, window_params = [{pipeline_mode = #tpu.pipeline_mode<synchronous>, transform_indices = @transform_0, window_bounds = array<i64: 24, 48>}, {transform_indices = @transform_1, window_bounds = array<i64: 48, 128>}, {pipeline_mode = #tpu.pipeline_mode<synchronous>, transform_indices = @transform_2, window_bounds = array<i64: 24, 1>}, {transform_indices = @transform_3, window_bounds = array<i64: 24, 128>}]} {
    %c0 = arith.constant 0 : index
    %c0_0 = arith.constant 0 : index
    %0 = vector.load %arg2[%c0, %c0_0] : memref<48x128xf32, #tpu.memory_space<vmem>>, vector<48x128xf32>
    %c0_1 = arith.constant 0 : index
    %c0_2 = arith.constant 0 : index
    %1 = vector.load %arg1[%c0_1, %c0_2] : memref<24x48xf32, #tpu.memory_space<vmem>>, vector<24x48xf32>
    %cst = arith.constant dense<0.000000e+00> : vector<24x128xf32>
    %2 = tpu.matmul %1, %0, %cst {dimension_numbers = #tpu.dot_dimension_numbers<[1], [0], [0], [1], [0, 0, 1, 1], [], []>} : vector<24x48xf32>, vector<48x128xf32>, vector<24x128xf32> -> vector<24x128xf32>
    %c0_3 = arith.constant 0 : index
    %c0_4 = arith.constant 0 : index
    %3 = vector.load %arg3[%c0_3, %c0_4] : memref<24x1xf32, #tpu.memory_space<vmem>>, vector<24x1xf32>
    %4 = vector.broadcast %3 : vector<24x1xf32> to vector<24x128xf32>
    %5 = arith.addf %2, %4 : vector<24x128xf32>
    %c0_5 = arith.constant 0 : index
    %c0_6 = arith.constant 0 : index
    %6 = vector.load %arg4[%c0_5, %c0_6] : memref<24x128xf32, #tpu.memory_space<vmem>>, vector<24x128xf32>
    tpu.vector_store %arg4[%c0_5, %c0_6], %5 {strides = array<i32>} : memref<24x128xf32, #tpu.memory_space<vmem>>, vector<24x128xf32>,
    return
  }
  func.func @transform_0(%arg0: i32) -> (i32, i32) {
    %c0_i32 = arith.constant 0 : i32
    %c0_i32_0 = arith.constant 0 : i32
    %c0_i32_1 = arith.constant 0 : i32
    return %c0_i32, %c0_i32_0 : i32, i32
  }
  func.func @transform_1(%arg0: i32) -> (i32, i32) {
    %c0_i32 = arith.constant 0 : i32
    %c0_i32_0 = arith.constant 0 : i32
    return %c0_i32, %arg0 : i32, i32
  }
  func.func @transform_2(%arg0: i32) -> (i32, i32) {
    %c0_i32 = arith.constant 0 : i32
    %c0_i32_0 = arith.constant 0 : i32
    %c0_i32_1 = arith.constant 0 : i32
    return %c0_i32, %c0_i32_0 : i32, i32
  }
  func.func @transform_3(%arg0: i32) -> (i32, i32) {
    %c0_i32 = arith.constant 0 : i32
    %c0_i32_0 = arith.constant 0 : i32
    return %c0_i32, %arg0 : i32, i32
  }
}

</mosaic_0001>

<bundles_post_ra>
// kernel: tpu_custom_call.1
= control target key start
LH: loop header
LB: loop body
LE: loop exit
PB: predicated region body
PF: predicated region fallthrough
CT: control target
= control target key end

     0   :  { %8 = vsyncpa [#allocation3], 0  ;;  %s324_s0 = inlined_call_operand.vmem [shape: f32[24,48], index: 0, kind: input, shape index: {}]   ;;  %s325_s1 = inlined_call_operand.hbm [shape: f32[48,128], index: 1, kind: input, shape index: {}]   ;;  %s326_s2 = inlined_call_operand.vmem [shape: f32[24,1], index: 2, kind: input, shape index: {}]   ;;  %s327_s3 = inlined_call_operand.hbm [shape: f32[24,128], index: 3, kind: output, shape index: {}]  }
   0x1   :  { %9 = vsyncpa [#allocation4], 0  ;;  %s264_s12 = smov [#allocation2]  }
   0x2   :  { %s17_s13 = sshll.u32 %s264_s12, 4  ;;  %s18_s13 = int_to_ptr.vmem [resolvable:$true] %s17_s13 }
   0x3   :  { %s228_s14 = scalar_lea.vmem %s18_s13, 768  ;;  %p233_p1 = scmp.lt.s32.totalorder %s18_s13, %s18_s13 }
   0x4   :  { %p229_p0 = scmp.ne.s32.totalorder %s18_s13, %s228_s14  ;;  %p234_p2 = scmp.lt.s32.totalorder %s228_s14, %s228_s14 }
   0x6   :  { %p235_p3 = por %p234_p2, %p233_p1 }
   0x8   :  { %p236_p4 = pnand %p235_p3, %p229_p0 }
   0xa   :  { %239 = shalt.err (!%p236_p4)
}
   0xb   :  { %s265_s15 = smov 128   ;;  %s266_s16 = smov 8  }
   0xc   :  { %23 = dma.hbm_to_vmem [thread:$0]  %s325_s1, 768, %s18_s13, [#allocation3], %s265_s15, %s265_s15, %s266_s16  }
   0xd   :  { %260 = dma.done.wait [#allocation3], 768  }
   0xe   :  { %261 = vsyncadd [#allocation3], 4294966528  ;;  %v267_v0 = vmov 0.0   ;;  %vm268_vm0 = vmmov 0   ;;  %v269_v1 = vmov 0   ;;  %v34_v2 = vld [vmem:[#allocation2 + $0x28] sm:$0xff] }
   0xf   :  { %178 = vmatprep.subr.mxu0 %v267_v0  ;;  %199 = vmatprep.subr.mxu1 %v267_v0  ;;  %v33_v3 = vld [vmem:[#allocation2 + $0x20] sm:$0xff]  ;;  %v32_v4 = vld [vmem:[#allocation2 + $0x18] sm:$0xff]  ;;  %v31_v5 = vld [vmem:[#allocation2 + $0x10] sm:$0xff]  ;;  %vm56_vm1 = vcmask 392192   ;;  %s270_s30 = smov [#allocation5]  }
  0x10   :  { %190 = vmatprep.mubr.msk.f32.mxu0 %vm268_vm0, %v267_v0  ;;  %193 = vmatprep.mubr.msk.f32.mxu1 %vm268_vm0, %v267_v0  ;;  %v30_v6 = vld [vmem:[#allocation2 + $0x8] sm:$0xff]  ;;  %v29_v7 = vld [vmem:[#allocation2] sm:$0xff]  ;;  %v40_v11 = vld [vmem:[%s326_s2 + $0x10] sm:$0xff]  ;;  %s154_s4 = sshll.u32 %s270_s30, 4  ;;  %s155_s4 = int_to_ptr.vmem [resolvable:$true] %s154_s4 }
  0x11   :  { %218 = vset.pattern.permute.xlu0 %v269_v1  ;;  %219 = vset.pattern.permute.xlu1 %v269_v1  ;;  %v35_v8 = vld [vmem:[%s324_s0] sm:$0xff]  ;;  %v36_v9 = vld [vmem:[%s324_s0 + $0x8] sm:$0xff]  ;;  %v37_v12 = vld [vmem:[%s324_s0 + $0x10] sm:$0xff]  ;;  %s240_s0 = scalar_lea.vmem %s155_s4, 384  ;;  %p245_p6 = scmp.lt.s32.totalorder %s155_s4, %s155_s4 }
  0x12   :  { %179 = vmatpush3.msra.mxu0 %v34_v2  ;;  %205 = vmatpush3.msra.mxu1 %v34_v2  ;;  %v38_v10 = vld [vmem:[%s326_s2] sm:$0xff]  ;;  %v39_v13 = vld [vmem:[%s326_s2 + $0x8] sm:$0xff]  ;;  %p241_p5 = scmp.ne.s32.totalorder %s155_s4, %s240_s0  ;;  %p246_p7 = scmp.lt.s32.totalorder %s240_s0, %s240_s0 }
  0x13   :  { %180 = vmatprep.subr.mxu0 %v267_v0  ;;  %200 = vmatprep.subr.mxu1 %v267_v0 }
  0x14   :  { %181 = vmatpush3.msra.mxu0 %v33_v3  ;;  %206 = vmatpush3.msra.mxu1 %v33_v3  ;;  %p247_p8 = por %p246_p7, %p245_p6 }
  0x15   :  { %182 = vmatprep.subr.mxu0 %v267_v0  ;;  %201 = vmatprep.subr.mxu1 %v267_v0 }
  0x16   :  { %183 = vmatpush3.msra.mxu0 %v32_v4  ;;  %207 = vmatpush3.msra.mxu1 %v32_v4  ;;  %p248_p9 = pnand %p247_p8, %p241_p5 }
  0x17   :  { %184 = vmatprep.subr.mxu0 %v267_v0  ;;  %202 = vmatprep.subr.mxu1 %v267_v0 }
  0x18   :  { %185 = vmatpush3.msra.mxu0 %v31_v5  ;;  %208 = vmatpush3.msra.mxu1 %v31_v5 }
  0x19   :  { %186 = vmatprep.subr.mxu0 %v267_v0  ;;  %203 = vmatprep.subr.mxu1 %v267_v0 }
  0x1a   :  { %187 = vmatpush3.msra.mxu0 %v30_v6  ;;  %209 = vmatpush3.msra.mxu1 %v30_v6 }
  0x1b   :  { %188 = vmatprep.subr.mxu0 %v267_v0  ;;  %204 = vmatprep.subr.mxu1 %v267_v0 }
  0x1c   :  { %189 = vmatpush3.msra.mxu0 %v29_v7  ;;  %210 = vmatpush3.msra.mxu1 %v29_v7 }
  0x1d   :  { %191 = vmatmul.mubr.msk.f32.vlgmr.msra.gmra.mxu0 %vm56_vm1, %v35_v8  ;;  %194 = vmatmul.mubr.msk.f32.vlgmr.msra.gmra.mxu1 %vm56_vm1, %v36_v9 }
  0x1e   :  { %196 = vmatprep.mubr.msk.f32.mxu1 %vm268_vm0, %v267_v0  ;;  %43 = vperm.xlu0 %218, %v38_v10  }
  0x1f   :  { %53 = vperm.xlu1 %219, %v40_v11  }
  0x21   :  { %197 = vmatmul.mubr.msk.f32.gmra.mxu1 %vm56_vm1, %v37_v12 }
  0x22   :  { %48 = vperm.xlu0 %218, %v39_v13  }
  0x99   :  { %v44_v14 = vpop.permute.xlu0 %43 }
  0x9a   :  { %v54_v20 = vpop.permute.xlu1 %53 }
  0x9d   :  { %v49_v15 = vpop.permute.xlu0 %48 }
  0xdd   :  { %v132_v16 = vpop.f32.mrf.mxu0  ;;  %v137_v17 = vpop.f32.mrf.mxu1 }
  0xde   :  { %v133_v18 = vadd.f32 %v132_v16, %v44_v14  ;;  %v138_v19 = vadd.f32 %v137_v17, %v49_v15 }
  0xdf   :  { %v195_v21 = vpop.f32.mrf.mxu1  ;;  %v192_v22 = vpop.f32.mrf.mxu0 }
  0xe0   :  { %146 = vst [vmem:[#allocation5] sm:$0xff] %v133_v18  ;;  %147 = vst [vmem:[#allocation5 + $0x8] sm:$0xff] %v138_v19 }
  0xe1   :  { %v142_v23 = vpop.f32.mrf.mxu1 }
  0xe2   :  { %v143_v24 = vadd.f32 %v142_v23, %v54_v20 }
  0xe3   :  { %v198_v25 = vpop.f32.mrf.mxu1 }
  0xe4   :  { %148 = vst [vmem:[#allocation5 + $0x10] sm:$0xff] %v143_v24 }
  0xe5   :  { %251 = shalt.err (!%p248_p9)
}
  0xe6   :  { %160 = dma.vmem_to_hbm [thread:$0]  %s155_s4, 384, %s327_s3, [#allocation4], %s265_s15, %s265_s15, %s266_s16  }
  0xe7   :  { %262 = dma.done.wait [#allocation4], 384  }
  0xe8   :  { %263 = vsyncadd [#allocation4], 4294966912 }
  0xe9   :  { %164 = vsyncpa [#allocation3], 1 }
  0xea   :  { %165 = vsyncpa [#allocation4], 1 }

</bundles_post_ra>
